<compile_context>
chip_gen: v7x
topology: tpu7x:2x2x1
jax: 0.10.0
libtpu: 0.0.40
codegen_flags: <defaults>
</compile_context>

<pallas_src>
import jax
import jax.numpy as jnp
from jax.experimental import pallas as pl
from jax.experimental.pallas import tpu as pltpu

CLS_PAD = 128  # lane-dense padded class dimension


def net0_head_kernel(dom_ref, z_ref, w_ref, b_ref, y_ref, zpool_ref):
    # z_ref: (B, S, C)  layer4 features, spatial flattened on sublanes, C on lanes
    # w_ref: (1, C, CLS_PAD) selected classifier weight, already transposed + padded
    # b_ref: (1, 1, CLS_PAD) selected classifier bias, padded
    del dom_ref  # only used by the index_maps to pick the classifier

    z = z_ref[...]                                   # (B, S, C) f32
    inv_s = 1.0 / z.shape[1]                         # static spatial size
    pooled = jnp.sum(z, axis=1) * inv_s              # global avg pool -> (B, C)
    zpool_ref[...] = pooled                          # module's second output `z`

    w = w_ref[0]                                     # (C, CLS_PAD), no in-kernel .T
    y = jnp.dot(pooled, w, preferred_element_type=jnp.float32) + b_ref[0]
    y_ref[...] = y                                   # (B, CLS_PAD), lane-dense store


def net0_head_forward(z4, classifier_weights, classifier_biases, domainid, num_class):
    """Fused avgpool + classifiers[domainid] head of net0. Returns (y, z)."""
    B, C, H, W = z4.shape
    S = H * W

    # One-time wrapper layout work (not per-call in-kernel cost):
    # NCHW -> (B, S, C): C lands on lanes, which is both the pooled-feature lane
    # layout and the GEMM contraction layout.
    z_bsc = jnp.transpose(z4.reshape(B, C, S), (0, 2, 1))

    # Stack the 3 classifiers pre-transposed (C, num_class) and zero-pad the class
    # dim to 128 lanes so every store / VPU op is unmasked.
    w_stack = jnp.stack([jnp.transpose(w) for w in classifier_weights])      # (3, C, nc)
    w_stack = jnp.pad(w_stack, ((0, 0), (0, 0), (0, CLS_PAD - num_class)))
    b_stack = jnp.stack([b.reshape(1, -1) for b in classifier_biases])       # (3, 1, nc)
    b_stack = jnp.pad(b_stack, ((0, 0), (0, 0), (0, CLS_PAD - num_class)))

    dom = jnp.asarray([domainid], dtype=jnp.int32)   # scalar-prefetched selector

    grid_spec = pltpu.PrefetchScalarGridSpec(
        num_scalar_prefetch=1,
        grid=(1,),
        in_specs=[
            pl.BlockSpec((B, S, C), lambda i, dom: (0, 0, 0)),
            # Only the selected classifier's weight/bias block is DMA'd.
            pl.BlockSpec((1, C, CLS_PAD), lambda i, dom: (dom[0], 0, 0)),
            pl.BlockSpec((1, 1, CLS_PAD), lambda i, dom: (dom[0], 0, 0)),
        ],
        out_specs=(
            pl.BlockSpec((B, CLS_PAD), lambda i, dom: (0, 0)),
            pl.BlockSpec((B, C), lambda i, dom: (0, 0)),
        ),
    )

    y_pad, zpool = pl.pallas_call(
        net0_head_kernel,
        out_shape=(jax.ShapeDtypeStruct((B, CLS_PAD), jnp.float32),
                   jax.ShapeDtypeStruct((B, C), jnp.float32)),
        grid_spec=grid_spec,
        compiler_params=pltpu.CompilerParams(dimension_semantics=("arbitrary",)),
    )(dom, z_bsc, w_stack, b_stack)

    return y_pad[:, :num_class], zpool


def init_classifiers(key, feature_dim, num_class, n_domains=3):
    """Deterministic nn.Linear(feature_dim, num_class) init for the 3 classifiers."""
    ks = jax.random.split(key, 2 * n_domains)
    bound = 1.0 / (feature_dim ** 0.5)
    ws = [jax.random.uniform(ks[2 * i], (num_class, feature_dim), jnp.float32,
                             -bound, bound) for i in range(n_domains)]
    bs = [jax.random.uniform(ks[2 * i + 1], (num_class,), jnp.float32,
                             -bound, bound) for i in range(n_domains)]
    return ws, bs


if __name__ == "__main__":
    key = jax.random.PRNGKey(0)
    kz, kp = jax.random.split(key)

    # Small shapes consistent with net0('res18'): feature_dim=512, 4x4 layer4 map.
    B, C, H, W = 2, 512, 4, 4
    num_class, domainid = 7, 1

    z4 = jax.random.normal(kz, (B, C, H, W), jnp.float32)
    Ws, bs = init_classifiers(kp, C, num_class)

    y, z = net0_head_forward(z4, Ws, bs, domainid, num_class)
    jax.block_until_ready((y, z))

    # Pure-JAX reference of net0's head: z = avgpool(z4).squeeze(); y = Linear_d(z)
    z_ref = jnp.mean(z4, axis=(2, 3))
    y_ref = z_ref @ Ws[domainid].T + bs[domainid]

    assert y.shape == (B, num_class) and z.shape == (B, C)
    assert jnp.allclose(z, z_ref, atol=1e-5)
    assert jnp.allclose(y, y_ref, atol=2e-3, rtol=2e-3)

    print("KERNEL_OK")
</pallas_src>

<mosaic_0001>
module attributes {stable_mosaic.version = 11 : i64} {
  func.func @net0_head_kernel(%arg0: i32, %arg1: memref<1xi32, #tpu.memory_space<smem>>, %arg2: memref<2x16x512xf32, #tpu.memory_space<vmem>>, %arg3: memref<1x512x128xf32, #tpu.memory_space<vmem>>, %arg4: memref<1x1x128xf32, #tpu.memory_space<vmem>>, %arg5: memref<2x128xf32, #tpu.memory_space<vmem>>, %arg6: memref<2x512xf32, #tpu.memory_space<vmem>>) attributes {dimension_semantics = [#tpu.dimension_semantics<arbitrary>], iteration_bounds = array<i64: 1>, scalar_prefetch = 1 : i64, scratch_operands = 0 : i64, tpu.core_type = #tpu.core_type<tc>, window_params = [{pipeline_mode = #tpu.pipeline_mode<synchronous>, transform_indices = @transform_0, window_bounds = array<i64: 2, 16, 512>}, {transform_indices = @transform_1, window_bounds = array<i64: 1, 512, 128>}, {transform_indices = @transform_2, window_bounds = array<i64: 1, 1, 128>}, {pipeline_mode = #tpu.pipeline_mode<synchronous>, transform_indices = @transform_3, window_bounds = array<i64: 2, 128>}, {pipeline_mode = #tpu.pipeline_mode<synchronous>, transform_indices = @transform_4, window_bounds = array<i64: 2, 512>}]} {
    %c0 = arith.constant 0 : index
    %c0_0 = arith.constant 0 : index
    %c0_1 = arith.constant 0 : index
    %0 = vector.load %arg2[%c0, %c0_0, %c0_1] : memref<2x16x512xf32, #tpu.memory_space<vmem>>, vector<2x16x512xf32>
    %cst = arith.constant dense<0.000000e+00> : vector<2x512xf32>
    %1 = vector.multi_reduction <add>, %0, %cst [1] : vector<2x16x512xf32> to vector<2x512xf32>
    %cst_2 = arith.constant 6.250000e-02 : f32
    %2 = vector.broadcast %cst_2 : f32 to vector<2x512xf32>
    %3 = arith.mulf %1, %2 : vector<2x512xf32>
    %c0_3 = arith.constant 0 : index
    %c0_4 = arith.constant 0 : index
    %4 = vector.load %arg6[%c0_3, %c0_4] : memref<2x512xf32, #tpu.memory_space<vmem>>, vector<2x512xf32>
    tpu.vector_store %arg6[%c0_3, %c0_4], %3 {strides = array<i32>} : memref<2x512xf32, #tpu.memory_space<vmem>>, vector<2x512xf32>,
    %c0_5 = arith.constant 0 : index
    %c0_6 = arith.constant 0 : index
    %c0_7 = arith.constant 0 : index
    %5 = vector.load %arg3[%c0_5, %c0_6, %c0_7] : memref<1x512x128xf32, #tpu.memory_space<vmem>>, vector<1x512x128xf32>
    %6 = vector.shape_cast %5 : vector<1x512x128xf32> to vector<512x128xf32>
    %cst_8 = arith.constant dense<0.000000e+00> : vector<2x128xf32>
    %7 = tpu.matmul %3, %6, %cst_8 {dimension_numbers = #tpu.dot_dimension_numbers<[1], [0], [0], [1], [0, 0, 1, 1], [], []>} : vector<2x512xf32>, vector<512x128xf32>, vector<2x128xf32> -> vector<2x128xf32>
    %c0_9 = arith.constant 0 : index
    %c0_10 = arith.constant 0 : index
    %c0_11 = arith.constant 0 : index
    %8 = vector.load %arg4[%c0_9, %c0_10, %c0_11] : memref<1x1x128xf32, #tpu.memory_space<vmem>>, vector<1x1x128xf32>
    %9 = vector.shape_cast %8 : vector<1x1x128xf32> to vector<1x128xf32>
    %10 = vector.broadcast %9 : vector<1x128xf32> to vector<2x128xf32>
    %11 = arith.addf %7, %10 : vector<2x128xf32>
    %c0_12 = arith.constant 0 : index
    %c0_13 = arith.constant 0 : index
    %12 = vector.load %arg5[%c0_12, %c0_13] : memref<2x128xf32, #tpu.memory_space<vmem>>, vector<2x128xf32>
    tpu.vector_store %arg5[%c0_12, %c0_13], %11 {strides = array<i32>} : memref<2x128xf32, #tpu.memory_space<vmem>>, vector<2x128xf32>,
    return
  }
  func.func @transform_0(%arg0: i32, %arg1: memref<1xi32, #tpu.memory_space<smem>>) -> (i32, i32, i32) {
    %c0_i32 = arith.constant 0 : i32
    %c0_i32_0 = arith.constant 0 : i32
    %c0_i32_1 = arith.constant 0 : i32
    %c0_i32_2 = arith.constant 0 : i32
    return %c0_i32, %c0_i32_0, %c0_i32_1 : i32, i32, i32
  }
  func.func @transform_1(%arg0: i32, %arg1: memref<1xi32, #tpu.memory_space<smem>>) -> (i32, i32, i32) {
    %c0 = arith.constant 0 : index
    %0 = memref.load %arg1[%c0] : memref<1xi32, #tpu.memory_space<smem>>
    %c0_i32 = arith.constant 0 : i32
    %c0_i32_0 = arith.constant 0 : i32
    %c0_i32_1 = arith.constant 0 : i32
    return %0, %c0_i32, %c0_i32_0 : i32, i32, i32
  }
  func.func @transform_2(%arg0: i32, %arg1: memref<1xi32, #tpu.memory_space<smem>>) -> (i32, i32, i32) {
    %c0 = arith.constant 0 : index
    %0 = memref.load %arg1[%c0] : memref<1xi32, #tpu.memory_space<smem>>
    %c0_i32 = arith.constant 0 : i32
    %c0_i32_0 = arith.constant 0 : i32
    %c0_i32_1 = arith.constant 0 : i32
    return %0, %c0_i32, %c0_i32_0 : i32, i32, i32
  }
  func.func @transform_3(%arg0: i32, %arg1: memref<1xi32, #tpu.memory_space<smem>>) -> (i32, i32) {
    %c0_i32 = arith.constant 0 : i32
    %c0_i32_0 = arith.constant 0 : i32
    %c0_i32_1 = arith.constant 0 : i32
    return %c0_i32, %c0_i32_0 : i32, i32
  }
  func.func @transform_4(%arg0: i32, %arg1: memref<1xi32, #tpu.memory_space<smem>>) -> (i32, i32) {
    %c0_i32 = arith.constant 0 : i32
    %c0_i32_0 = arith.constant 0 : i32
    %c0_i32_1 = arith.constant 0 : i32
    return %c0_i32, %c0_i32_0 : i32, i32
  }
}

</mosaic_0001>

<bundles_post_ra>
// kernel: tpu_custom_call.1
= control target key start
LH: loop header
LB: loop body
LE: loop exit
PB: predicated region body
PF: predicated region fallthrough
CT: control target
= control target key end

     0   :  { %12 = vsyncpa [#allocation5], 0  ;;  %s849_s0 = inlined_call_operand.<no memory space> [shape: s32[1], index: 0, kind: input, shape index: {}]   ;;  %s850_s1 = inlined_call_operand.hbm [shape: f32[2,16,512], index: 1, kind: input, shape index: {}]   ;;  %s851_s2 = inlined_call_operand.hbm [shape: f32[3,512,128], index: 2, kind: input, shape index: {}]   ;;  %s852_s3 = inlined_call_operand.vmem [shape: f32[3,1,128], index: 3, kind: input, shape index: {}]   ;;  %s853_s4 = inlined_call_operand.hbm [shape: f32[2,128], index: 4, kind: output, shape index: {0}]   ;;  %s854_s5 = inlined_call_operand.hbm [shape: f32[2,512], index: 5, kind: output, shape index: {1}]  }
   0x1   :  { %13 = vsyncpa [#allocation8], 0 }
   0x2   :  { %14 = vsyncpa [#allocation6], 0 }
   0x3   :  { %15 = vsyncpa [#allocation11], 0  ;;  %s704_s18 = smov [#allocation4]   ;;  %s462_s22 = sshll.u32 %s849_s0, 13 }
   0x4   :  { %s21_s19 = sshll.u32 %s704_s18, 4  ;;  %s606_s25 = scalar_lea.hbm %s850_s1, 2048  ;;  %s22_s19 = int_to_ptr.vmem [resolvable:$true] %s21_s19 }
   0x5   :  { %p607_p0 = scmp.ne.s32.totalorder %s850_s1, %s606_s25  ;;  %p610_p1 = scmp.lt.u32.totalorder %s606_s25, %s850_s1 }
   0x7   :  { %p612_p2 = pnand %p610_p1, %p607_p0 }
   0x9   :  { %615 = shalt.err (!%p612_p2)
}
   0xa   :  { %s616_s30 = scalar_lea.vmem %s22_s19, 2048  ;;  %p621_p4 = scmp.lt.s32.totalorder %s22_s19, %s22_s19 }
   0xb   :  { %p617_p3 = scmp.ne.s32.totalorder %s22_s19, %s616_s30  ;;  %p622_p5 = scmp.lt.s32.totalorder %s616_s30, %s616_s30 }
   0xd   :  { %p623_p6 = por %p622_p5, %p621_p4 }
   0xf   :  { %p624_p7 = pnand %p623_p6, %p617_p3 }
  0x11   :  { %627 = shalt.err (!%p624_p7)
}
  0x12   :  { %s705_s6 = smov 512   ;;  %s706_s7 = smov 32  }
  0x13   :  { %27 = dma.hbm_to_vmem [thread:$0]  %s850_s1, 2048, %s22_s19, [#allocation5], %s705_s6, %s705_s6, %s706_s7  }
  0x14   :  { %s36_s12 = scalar_lea.hbm %s851_s2, %s462_s22  ;;  %s707_s13 = smov [#allocation7]  }
  0x15   :  { %s37_s14 = sshll.u32 %s707_s13, 4  ;;  %s628_s15 = scalar_lea.hbm %s36_s12, 8192  ;;  %s38_s14 = int_to_ptr.vmem [resolvable:$true] %s37_s14 }
  0x16   :  { %p629_p8 = scmp.ne.s32.totalorder %s36_s12, %s628_s15  ;;  %s630_s18 = scalar_lea.hbm %s851_s2, 24576 }
  0x17   :  { %p631_p9 = scmp.lt.u32.totalorder %s36_s12, %s851_s2  ;;  %p632_p10 = scmp.lt.u32.totalorder %s630_s18, %s628_s15 }
  0x18   :  { %p634_p12 = scmp.lt.u32.totalorder %s628_s15, %s36_s12 }
  0x19   :  { %p633_p11 = por %p632_p10, %p631_p9 }
  0x1b   :  { %p635_p13 = por %p634_p12, %p633_p11 }
  0x1d   :  { %p636_p0 = pnand %p635_p13, %p629_p8 }
  0x1f   :  { %639 = shalt.err (!%p636_p0)
}
  0x20   :  { %s640_s1 = scalar_lea.vmem %s38_s14, 8192  ;;  %p645_p2 = scmp.lt.s32.totalorder %s38_s14, %s38_s14 }
  0x21   :  { %p641_p1 = scmp.ne.s32.totalorder %s38_s14, %s640_s1  ;;  %p646_p3 = scmp.lt.s32.totalorder %s640_s1, %s640_s1 }
  0x23   :  { %p647_p4 = por %p646_p3, %p645_p2 }
  0x25   :  { %p648_p5 = pnand %p647_p4, %p641_p1 }
  0x27   :  { %651 = shalt.err (!%p648_p5)
}
  0x28   :  { %s708_s19 = smov 128   ;;  %s709_s22 = smov 8  }
  0x29   :  { %43 = dma.hbm_to_vmem [thread:$0]  %s36_s12, 8192, %s38_s14, [#allocation8], %s708_s19, %s708_s19, %s709_s22  }
  0x2a   :  { %696 = dma.done.wait [#allocation5], 2048  }
  0x2b   :  { %697 = vsyncadd [#allocation5], 4294965248 }
  0x2c   :  { %698 = dma.done.wait [#allocation8], 8192  }
  0x2d   :  { %699 = vsyncadd [#allocation8], 4294959104  ;;  %v220_v0 = vld [vmem:[#allocation7 + $0x80] sm:$0xff]  ;;  %v221_v1 = vld [vmem:[#allocation7 + $0x88] sm:$0xff]  ;;  %vm194_vm0 = vcmask 1041409   ;;  %vm196_vm1 = vcmask 1043459  }
  0x2e   :  { %v204_v2 = vld [vmem:[#allocation7] sm:$0xff]  ;;  %v533_v3 = vpack.c.bf16 %v221_v1, %v220_v0  ;;  %v205_v4 = vld [vmem:[#allocation7 + $0x8] sm:$0xff]  ;;  %v222_v11 = vld [vmem:[#allocation7 + $0x90] sm:$0xff]  ;;  %vm198_vm2 = vcmask 1045509   ;;  %vm200_vm3 = vcmask 1047559   ;;  %s711_s2 = smov [#allocation10]  }
  0x2f   :  { %v252_v5 = vld [vmem:[#allocation7 + $0x180] sm:$0xff]  ;;  %v253_v6 = vld [vmem:[#allocation7 + $0x188] sm:$0xff]  ;;  %v535_v7 = vpack.c.bf16 %v205_v4, %v204_v2  ;;  %v223_v13 = vld [vmem:[#allocation7 + $0x98] sm:$0xff]  ;;  %s440_s23 = sshll.u32 %s711_s2, 4  ;;  %s441_s23 = int_to_ptr.vmem [resolvable:$true] %s440_s23 }
  0x30   :  { %v565_v8 = vpack.c.bf16 %v253_v6, %v252_v5  ;;  %v236_v9 = vld [vmem:[#allocation7 + $0x100] sm:$0xff]  ;;  %v237_v10 = vld [vmem:[#allocation7 + $0x108] sm:$0xff]  ;;  %534 = vmatprep.subr.bf16.mxu0 %v533_v3  ;;  %v206_v14 = vld [vmem:[#allocation7 + $0x10] sm:$0xff]  ;;  %v537_v16 = vpack.c.bf16 %v223_v13, %v222_v11  ;;  %s652_s24 = scalar_lea.vmem %s441_s23, 128  ;;  %p657_p7 = scmp.lt.s32.totalorder %s441_s23, %s441_s23 }
  0x31   :  { %v567_v12 = vpack.c.bf16 %v237_v10, %v236_v9  ;;  %v207_v15 = vld [vmem:[#allocation7 + $0x18] sm:$0xff]  ;;  %536 = vmatpush3.bf16.msra.mxu0 %v535_v7  ;;  %v254_v18 = vld [vmem:[#allocation7 + $0x190] sm:$0xff]  ;;  %v224_v23 = vld [vmem:[#allocation7 + $0xa0] sm:$0xff]  ;;  %p653_p6 = scmp.ne.s32.totalorder %s441_s23, %s652_s24  ;;  %p658_p8 = scmp.lt.s32.totalorder %s652_s24, %s652_s24 }
  0x32   :  { %566 = vmatprep.subr.bf16.mxu1 %v565_v8  ;;  %v539_v17 = vpack.c.bf16 %v207_v15, %v206_v14  ;;  %v255_v19 = vld [vmem:[#allocation7 + $0x198] sm:$0xff]  ;;  %v238_v20 = vld [vmem:[#allocation7 + $0x110] sm:$0xff]  ;;  %v225_v24 = vld [vmem:[#allocation7 + $0xa8] sm:$0xff]  ;;  %538 = vmatprep.subr.bf16.mxu0 %v537_v16  ;;  %v710_v14 = vmov 1983009808   ;;  %v160_v16 = vlaneseq }
  0x33   :  { %568 = vmatpush3.bf16.msra.mxu1 %v567_v12  ;;  %v569_v21 = vpack.c.bf16 %v255_v19, %v254_v18  ;;  %v239_v22 = vld [vmem:[#allocation7 + $0x118] sm:$0xff]  ;;  %v541_v26 = vpack.c.bf16 %v225_v24, %v224_v23  ;;  %v208_v27 = vld [vmem:[#allocation7 + $0x20] sm:$0xff]  ;;  %v209_v28 = vld [vmem:[#allocation7 + $0x28] sm:$0xff]  ;;  %v775_v15 = vunpack.c.l.s4 %v710_v14  ;;  %p659_p9 = por %p658_p8, %p657_p7 }
  0x34   :  { %v571_v25 = vpack.c.bf16 %v239_v22, %v238_v20  ;;  %v256_v29 = vld [vmem:[#allocation7 + $0x1a0] sm:$0xff]  ;;  %v257_v30 = vld [vmem:[#allocation7 + $0x1a8] sm:$0xff]  ;;  %v543_v33 = vpack.c.bf16 %v209_v28, %v208_v27  ;;  %v226_v35 = vld [vmem:[#allocation7 + $0xb0] sm:$0xff] }
  0x35   :  { %570 = vmatprep.subr.bf16.mxu1 %v569_v21  ;;  %v240_v31 = vld [vmem:[#allocation7 + $0x120] sm:$0xff]  ;;  %v241_v32 = vld [vmem:[#allocation7 + $0x128] sm:$0xff]  ;;  %540 = vmatpush3.bf16.msra.mxu0 %v539_v17  ;;  %v573_v34 = vpack.c.bf16 %v257_v30, %v256_v29  ;;  %v227_v36 = vld [vmem:[#allocation7 + $0xb8] sm:$0xff]  ;;  %p660_p10 = pnand %p659_p9, %p653_p6 }
  0x36   :  { %v210_v37 = vld [vmem:[#allocation7 + $0x30] sm:$0xff]  ;;  %542 = vmatprep.subr.bf16.mxu0 %v541_v26  ;;  %v575_v38 = vpack.c.bf16 %v241_v32, %v240_v31  ;;  %v545_v39 = vpack.c.bf16 %v227_v36, %v226_v35  ;;  %v211_v40 = vld [vmem:[#allocation7 + $0x38] sm:$0xff]  ;;  %v228_v46 = vld [vmem:[#allocation7 + $0xc0] sm:$0xff]  ;;  %v794_v35 = vshrl.u32 %v160_v16, 7 }
  0x37   :  { %572 = vmatpush3.bf16.msra.mxu1 %v571_v25  ;;  %v258_v41 = vld [vmem:[#allocation7 + $0x1b0] sm:$0xff]  ;;  %v259_v42 = vld [vmem:[#allocation7 + $0x1b8] sm:$0xff]  ;;  %v229_v47 = vld [vmem:[#allocation7 + $0xc8] sm:$0xff]  ;;  %v547_v48 = vpack.c.bf16 %v211_v40, %v210_v37 }
  0x38   :  { %574 = vmatprep.subr.bf16.mxu1 %v573_v34  ;;  %v577_v43 = vpack.c.bf16 %v259_v42, %v258_v41  ;;  %v242_v44 = vld [vmem:[#allocation7 + $0x130] sm:$0xff]  ;;  %v243_v45 = vld [vmem:[#allocation7 + $0x138] sm:$0xff]  ;;  %v260_v49 = vld [vmem:[#allocation7 + $0x1c0] sm:$0xff]  ;;  %v549_v52 = vpack.c.bf16 %v229_v47, %v228_v46  ;;  %v159_v34 = vunpack.c.0.s8 %v775_v15 }
  0x39   :  { %544 = vmatpush3.bf16.msra.mxu0 %v543_v33  ;;  %v261_v50 = vld [vmem:[#allocation7 + $0x1c8] sm:$0xff]  ;;  %v579_v51 = vpack.c.bf16 %v243_v45, %v242_v44  ;;  %v212_v53 = vld [vmem:[#allocation7 + $0x40] sm:$0xff]  ;;  %v230_v58 = vld [vmem:[#allocation7 + $0xd0] sm:$0xff] }
  0x3a   :  { %546 = vmatprep.subr.bf16.mxu0 %v545_v39  ;;  %v213_v54 = vld [vmem:[#allocation7 + $0x48] sm:$0xff]  ;;  %v244_v55 = vld [vmem:[#allocation7 + $0x140] sm:$0xff]  ;;  %v581_v56 = vpack.c.bf16 %v261_v50, %v260_v49  ;;  %v231_v59 = vld [vmem:[#allocation7 + $0xd8] sm:$0xff] }
  0x3b   :  { %576 = vmatpush3.bf16.msra.mxu1 %v575_v38  ;;  %v245_v57 = vld [vmem:[#allocation7 + $0x148] sm:$0xff]  ;;  %v214_v60 = vld [vmem:[#allocation7 + $0x50] sm:$0xff]  ;;  %v263_v62 = vld [vmem:[#allocation7 + $0x1d8] sm:$0xff]  ;;  %v551_v63 = vpack.c.bf16 %v213_v54, %v212_v53  ;;  %v553_v4 = vpack.c.bf16 %v231_v59, %v230_v58 }
  0x3c   :  { %578 = vmatprep.subr.bf16.mxu1 %v577_v43  ;;  %v262_v61 = vld [vmem:[#allocation7 + $0x1d0] sm:$0xff]  ;;  %v215_v0 = vld [vmem:[#allocation7 + $0x58] sm:$0xff]  ;;  %v583_v3 = vpack.c.bf16 %v245_v57, %v244_v55  ;;  %v232_v5 = vld [vmem:[#allocation7 + $0xe0] sm:$0xff] }
  0x3d   :  { %548 = vmatpush3.bf16.msra.mxu0 %v547_v48  ;;  %v246_v1 = vld [vmem:[#allocation7 + $0x150] sm:$0xff]  ;;  %v247_v2 = vld [vmem:[#allocation7 + $0x158] sm:$0xff]  ;;  %v233_v6 = vld [vmem:[#allocation7 + $0xe8] sm:$0xff]  ;;  %v585_v8 = vpack.c.bf16 %v263_v62, %v262_v61  ;;  %v555_v20 = vpack.c.bf16 %v215_v0, %v214_v60 }
  0x3e   :  { %550 = vmatprep.subr.bf16.mxu0 %v549_v52  ;;  %v264_v7 = vld [vmem:[#allocation7 + $0x1e0] sm:$0xff]  ;;  %v769_v10 = vld [vmem:[#allocation7 + $0x68] sm:$0xff]  ;;  %v777_v17 = vld [vmem:[#allocation7 + $0xf0] sm:$0xff]  ;;  %v587_v24 = vpack.c.bf16 %v247_v2, %v246_v1  ;;  %v557_v25 = vpack.c.bf16 %v233_v6, %v232_v5 }
  0x3f   :  { %580 = vmatpush3.bf16.msra.mxu1 %v579_v51  ;;  %v767_v9 = vld [vmem:[#allocation7 + $0x60] sm:$0xff]  ;;  %v265_v11 = vld [vmem:[#allocation7 + $0x1e8] sm:$0xff]  ;;  %v779_v18 = vld [vmem:[#allocation7 + $0xf8] sm:$0xff] }
  0x40   :  { %582 = vmatprep.subr.bf16.mxu1 %v581_v56  ;;  %v771_v12 = vld [vmem:[#allocation7 + $0x160] sm:$0xff]  ;;  %v773_v13 = vld [vmem:[#allocation7 + $0x168] sm:$0xff]  ;;  %v781_v19 = vld [vmem:[#allocation7 + $0x70] sm:$0xff]  ;;  %v589_v30 = vpack.c.bf16 %v265_v11, %v264_v7  ;;  %v559_v36 = vpack.c.bf16 %v769_v10, %v767_v9  ;;  %v561_v43 = vpack.c.bf16 %v779_v18, %v777_v17 }
  0x41   :  { %552 = vmatpush3.bf16.msra.mxu0 %v551_v63  ;;  %v783_v21 = vld [vmem:[#allocation7 + $0x78] sm:$0xff]  ;;  %v785_v22 = vld [vmem:[#allocation7 + $0x1f0] sm:$0xff]  ;;  %v67_v28 = vld [vmem:[#allocation4] sm:$0xff]  ;;  %v591_v37 = vpack.c.bf16 %v773_v13, %v771_v12 }
  0x42   :  { %v787_v23 = vld [vmem:[#allocation7 + $0x1f8] sm:$0xff]  ;;  %554 = vmatprep.subr.bf16.mxu0 %v553_v4  ;;  %v789_v26 = vld [vmem:[#allocation7 + $0x170] sm:$0xff]  ;;  %v68_v29 = vld [vmem:[#allocation4 + $0x8] sm:$0xff]  ;;  %v563_v44 = vpack.c.bf16 %v783_v21, %v781_v19 }
  0x43   :  { %584 = vmatpush3.bf16.msra.mxu1 %v583_v3  ;;  %v791_v27 = vld [vmem:[#allocation7 + $0x178] sm:$0xff]  ;;  %v71_v31 = vld [vmem:[#allocation4 + $0x20] sm:$0xff]  ;;  %v72_v32 = vld [vmem:[#allocation4 + $0x28] sm:$0xff]  ;;  %v593_v50 = vpack.c.bf16 %v787_v23, %v785_v22 }
  0x44   :  { %586 = vmatprep.subr.bf16.mxu1 %v585_v8  ;;  %v75_v33 = vld [vmem:[#allocation4 + $0x40] sm:$0xff]  ;;  %v76_v38 = vld [vmem:[#allocation4 + $0x48] sm:$0xff]  ;;  %v83_v41 = vadd.f32 %v71_v31, %v67_v28  ;;  %v90_v42 = vadd.f32 %v72_v32, %v68_v29  ;;  %v69_v47 = vld [vmem:[#allocation4 + $0x10] sm:$0xff]  ;;  %v595_v57 = vpack.c.bf16 %v791_v27, %v789_v26 }
  0x45   :  { %v79_v39 = vld [vmem:[#allocation4 + $0x60] sm:$0xff]  ;;  %v80_v40 = vld [vmem:[#allocation4 + $0x68] sm:$0xff]  ;;  %556 = vmatpush3.bf16.msra.mxu0 %v555_v20  ;;  %v70_v48 = vld [vmem:[#allocation4 + $0x18] sm:$0xff] }
  0x46   :  { %v111_v45 = vadd.f32 %v79_v39, %v75_v33  ;;  %v118_v46 = vadd.f32 %v80_v40, %v76_v38  ;;  %v73_v49 = vld [vmem:[#allocation4 + $0x30] sm:$0xff]  ;;  %558 = vmatprep.subr.bf16.mxu0 %v557_v25  ;;  %v84_v51 = vrot.slane %v83_v41, 4  ;;  %v91_v52 = vrot.slane %v90_v42, 4  ;;  %v74_v53 = vld [vmem:[#allocation4 + $0x38] sm:$0xff] }
  0x47   :  { %588 = vmatpush3.bf16.msra.mxu1 %v587_v24  ;;  %v77_v54 = vld [vmem:[#allocation4 + $0x50] sm:$0xff]  ;;  %v78_v55 = vld [vmem:[#allocation4 + $0x58] sm:$0xff]  ;;  %v97_v56 = vadd.f32 %v73_v49, %v69_v47  ;;  %v104_v62 = vadd.f32 %v74_v53, %v70_v48 }
  0x48   :  { %590 = vmatprep.subr.bf16.mxu1 %v589_v30  ;;  %v112_v58 = vrot.slane %v111_v45, 4  ;;  %v119_v59 = vrot.slane %v118_v46, 4  ;;  %v81_v60 = vld [vmem:[#allocation4 + $0x70] sm:$0xff]  ;;  %v82_v61 = vld [vmem:[#allocation4 + $0x78] sm:$0xff]  ;;  %v85_v63 = vadd.f32 %v84_v51, %v83_v41  ;;  %v92_v0 = vadd.f32 %v91_v52, %v90_v42 }
  0x49   :  { %v98_v1 = vrot.slane %v97_v56, 4  ;;  %v125_v2 = vadd.f32 %v81_v60, %v77_v54  ;;  %560 = vmatpush3.bf16.msra.mxu0 %v559_v36  ;;  %v105_v5 = vrot.slane %v104_v62, 4  ;;  %v132_v6 = vadd.f32 %v82_v61, %v78_v55 }
  0x4a   :  { %v113_v3 = vadd.f32 %v112_v58, %v111_v45  ;;  %v120_v4 = vadd.f32 %v119_v59, %v118_v46  ;;  %562 = vmatprep.subr.bf16.mxu0 %v561_v43  ;;  %v86_v7 = vrot.slane %v85_v63, 2  ;;  %v93_v8 = vrot.slane %v92_v0, 2 }
  0x4b   :  { %592 = vmatpush3.bf16.msra.mxu1 %v591_v37  ;;  %v99_v9 = vadd.f32 %v98_v1, %v97_v56  ;;  %v126_v10 = vrot.slane %v125_v2, 4  ;;  %v106_v13 = vadd.f32 %v105_v5, %v104_v62  ;;  %v133_v14 = vrot.slane %v132_v6, 4 }
  0x4c   :  { %594 = vmatprep.subr.bf16.mxu1 %v593_v50  ;;  %v114_v11 = vrot.slane %v113_v3, 2  ;;  %v121_v12 = vrot.slane %v120_v4, 2  ;;  %v87_v16 = vadd.f32 %v86_v7, %v85_v63  ;;  %v94_v17 = vadd.f32 %v93_v8, %v92_v0 }
  0x4d   :  { %v100_v18 = vrot.slane %v99_v9, 2  ;;  %v127_v19 = vadd.f32 %v126_v10, %v125_v2  ;;  %564 = vmatpush3.bf16.msra.mxu0 %v563_v44  ;;  %v107_v22 = vrot.slane %v106_v13, 2  ;;  %v134_v23 = vadd.f32 %v133_v14, %v132_v6 }
  0x4e   :  { %v115_v20 = vadd.f32 %v114_v11, %v113_v3  ;;  %v122_v21 = vadd.f32 %v121_v12, %v120_v4  ;;  %v88_v24 = vrot.slane %v87_v16, 1  ;;  %v95_v25 = vrot.slane %v94_v17, 1 }
  0x4f   :  { %596 = vmatpush3.bf16.msra.mxu1 %v595_v57  ;;  %v101_v26 = vadd.f32 %v100_v18, %v99_v9  ;;  %v128_v27 = vrot.slane %v127_v19, 2  ;;  %v108_v30 = vadd.f32 %v107_v22, %v106_v13  ;;  %v135_v31 = vrot.slane %v134_v23, 2 }
  0x50   :  { %v116_v28 = vrot.slane %v115_v20, 1  ;;  %v123_v29 = vrot.slane %v122_v21, 1  ;;  %v89_v32 = vadd.f32 %v88_v24, %v87_v16  ;;  %v96_v33 = vadd.f32 %v95_v25, %v94_v17 }
  0x51   :  { %v102_v36 = vrot.slane %v101_v26, 1  ;;  %v129_v37 = vadd.f32 %v128_v27, %v127_v19  ;;  %v109_v40 = vrot.slane %v108_v30, 1  ;;  %v136_v41 = vadd.f32 %v135_v31, %v134_v23 }
  0x52   :  { %v117_v38 = vadd.f32 %v116_v28, %v115_v20  ;;  %v124_v39 = vadd.f32 %v123_v29, %v122_v21  ;;  %v139_v42 = vmul.f32 0.0625, %v89_v32  ;;  %v140_v43 = vmul.f32 0.0625, %v96_v33 }
  0x53   :  { %v103_v44 = vadd.f32 %v102_v36, %v101_v26  ;;  %v130_v45 = vrot.slane %v129_v37, 1  ;;  %v110_v48 = vadd.f32 %v109_v40, %v108_v30  ;;  %v137_v49 = vrot.slane %v136_v41, 1 }
  0x54   :  { %v143_v46 = vmul.f32 0.0625, %v117_v38  ;;  %v144_v47 = vmul.f32 0.0625, %v124_v39  ;;  %v155_v50 = vcombine.low %v139_v42, %v140_v43  ;;  %v162_v51 = vsub.s32 %v159_v34, %v794_v35 }
  0x55   :  { %v131_v52 = vadd.f32 %v130_v45, %v129_v37  ;;  %v141_v53 = vmul.f32 0.0625, %v103_v44  ;;  %v138_v57 = vadd.f32 %v137_v49, %v136_v41  ;;  %v142_v58 = vmul.f32 0.0625, %v110_v48 }
  0x56   :  { %v172_v54 = vcombine.low %v143_v46, %v144_v47  ;;  %v276_v55 = vsel %vm194_vm0, %v144_v47, %v140_v43  ;;  %v275_v56 = vsel %vm194_vm0, %v143_v46, %v139_v42  ;;  %v163_v61 = vrot.slane %v155_v50, %v162_v51 }
  0x57   :  { %347 = vmatprep.mubr.f32.mxu0 %v276_v55  ;;  %v145_v59 = vmul.f32 0.0625, %v131_v52  ;;  %v146_v60 = vmul.f32 0.0625, %v138_v57  ;;  %v156_v62 = vcombine.low %v141_v53, %v142_v58 }
  0x58   :  { %348 = vmatmul.mubr.f32.vlgmr.msra.gmra.mrb[0].mxu0 %v275_v56  ;;  %v180_v0 = vrot.slane %v172_v54, %v162_v51 }
  0x59   :  { %v277_v63 = vsel %vm194_vm0, %v145_v59, %v141_v53  ;;  %v173_v15 = vcombine.low %v145_v59, %v146_v60  ;;  %v278_v34 = vsel %vm194_vm0, %v146_v60, %v142_v58  ;;  %v170_v35 = vrot.slane %v156_v62, %v162_v51 }
  0x5a   :  { %417 = vmatprep.mubr.f32.mxu1 %v278_v34 }
  0x5b   :  { %v187_v1 = vrot.slane %v173_v15, %v162_v51  ;;  %418 = vmatmul.mubr.f32.vlgmr.msra.gmra.mrb[0].mxu1 %v277_v63  ;;  %v171_v2 = vcombine.low %v163_v61, %v170_v35 }
  0x5d   :  { %v188_v3 = vcombine.low %v180_v0, %v187_v1 }
  0x5f   :  { %v193_v4 = vrot.slane %v188_v3, 7 }
  0x61   :  { %v195_v5 = vsel %vm194_vm0, %v193_v4, %v171_v2 }
  0x62   :  { %v197_v6 = vsel %vm196_vm1, %v193_v4, %v195_v5 }
  0x63   :  { %v199_v7 = vsel %vm198_vm2, %v193_v4, %v197_v6 }
  0x64   :  { %v201_v8 = vsel %vm200_vm3, %v193_v4, %v199_v7 }
  0x65   :  { %203 = vst [vmem:[#allocation10] sm:$0xff] %v201_v8 }
  0x66   :  { %663 = shalt.err (!%p660_p10)
}
  0x67   :  { %s664_s27 = scalar_lea.hbm %s854_s5, 128 }
  0x68   :  { %p665_p11 = scmp.ne.s32.totalorder %s854_s5, %s664_s27  ;;  %p668_p12 = scmp.lt.u32.totalorder %s664_s27, %s854_s5 }
  0x6a   :  { %p670_p13 = pnand %p668_p12, %p665_p11 }
  0x6c   :  { %673 = shalt.err (!%p670_p13)
}
  0x6d   :  { %443 = dma.vmem_to_hbm [thread:$0]  %s441_s23, 128, %s854_s5, [#allocation11]  }
  0x6e   :  { %p63_p0 = scmp.lt.s32.totalorder %s849_s0, 2  ;;  %s712_s5 = smov [#allocation9]  }
  0x6f   :  { %s430_s16 = sshll.u32 %s712_s5, 4  ;;  %s431_s16 = int_to_ptr.vmem [resolvable:$true] %s430_s16 }
  0x70   :  { %s856_s0 = smov (!%p63_p0, %s849_s0), 2  ;;  %s674_s17 = scalar_lea.vmem %s431_s16, 32 }
  0x71   :  { %s65_s15 = scalar_lea.vmem %s852_s3, %s856_s0  ;;  %p675_p1 = scmp.ne.s32.totalorder %s431_s16, %s674_s17 }
  0x72   :  { %v461_v10 = vld [vmem:[%s65_s15] ss:$0 sm:$0xff]  ;;  %p679_p2 = scmp.lt.s32.totalorder %s431_s16, %s431_s16  ;;  %p680_p3 = scmp.lt.s32.totalorder %s674_s17, %s674_s17 }
  0x74   :  { %p681_p4 = por %p680_p3, %p679_p2 }
  0x76   :  { %p682_p5 = pnand %p681_p4, %p675_p1 }
 0x12b   :  { %v495_v9 = vpop.f32.mrb[0].mxu0 }
 0x12c   :  { %v496_v11 = vpop.f32.mrb[1].mxu0 }
 0x12d   :  { %v497_v12 = vadd.f32 %v496_v11, %v495_v9 }
 0x12e   :  { %v530_v14 = vpop.f32.mrb[0].mxu1 }
 0x12f   :  { %v350_v13 = vadd.f32 %v497_v12, %v461_v10  ;;  %v531_v16 = vpop.f32.mrb[1].mxu1 }
 0x130   :  { %v532_v17 = vadd.f32 %v531_v16, %v530_v14 }
 0x132   :  { %v420_v18 = vadd.f32 %v532_v17, %v350_v13 }
 0x134   :  { %423 = vst [vmem:[#allocation9] sm:$0x3] %v420_v18 }
 0x135   :  { %685 = shalt.err (!%p682_p5)
}
 0x136   :  { %s686_s18 = scalar_lea.hbm %s853_s4, 32 }
 0x137   :  { %p687_p6 = scmp.ne.s32.totalorder %s853_s4, %s686_s18  ;;  %p690_p7 = scmp.lt.u32.totalorder %s686_s18, %s853_s4 }
 0x139   :  { %p692_p8 = pnand %p690_p7, %p687_p6 }
 0x13b   :  { %695 = shalt.err (!%p692_p8)
}
 0x13c   :  { %433 = dma.vmem_to_hbm [thread:$0]  %s431_s16, 32, %s853_s4, [#allocation6]  }
 0x13d   :  { %700 = dma.done.wait [#allocation6], 32  }
 0x13e   :  { %701 = vsyncadd [#allocation6], 4294967264 }
 0x13f   :  { %702 = dma.done.wait [#allocation11], 128  }
 0x140   :  { %703 = vsyncadd [#allocation11], 4294967168 }
 0x141   :  { %450 = vsyncpa [#allocation5], 1 }
 0x142   :  { %451 = vsyncpa [#allocation8], 1 }
 0x143   :  { %452 = vsyncpa [#allocation6], 1 }
 0x144   :  { %453 = vsyncpa [#allocation11], 1 }

</bundles_post_ra>
